<compile_context>
chip_gen: v5e
topology: v5e:2x2
jax: 0.10.0
libtpu: 0.0.40
codegen_flags: <defaults>
</compile_context>

<pallas_src>
import jax
import jax.numpy as jnp
import numpy as np
from jax import lax
from jax.experimental import pallas as pl
from jax.experimental.pallas import tpu as pltpu

_KTAPS = 5                     # a 5x5 window covers the 1x1 / 3x3 / 5x5 branches
_OUT_DTYPE = jnp.bfloat16      # bandwidth-bound kernel: bf16 output writes


def _round_up(x, m):
    return (x + m - 1) // m * m


def _msf_kernel(band_ref, w_ref, b_ref, o_ref):
    """One (batch, row-tile) grid step.

    band_ref : (DXC, (TH+4)*W)    bf16  dx-expanded, row-halo'd input band
    w_ref    : (5, 3*Cout, DXC)   bf16  stacked conv weights (BN scale folded),
                                        one (3*Cout, DXC) block per dy shift
    b_ref    : (3*Cout, 1)        f32   folded BN biases (branch-major)
    o_ref    : (Cout, TH*W)       bf16  output tile (channels-major, lane-dense)
    """
    cout, m = o_ref.shape                       # Cout, TH*W
    band_len = band_ref.shape[1]                # (TH+4)*W
    img_w = (band_len - m) // 4                 # image width (row halo is 4)

    # 5 accumulating MXU dots, one per dy row shift; f32 accumulation.
    # Each operand is a static lane-slice of the band Ref (no patch scratch,
    # no full-band vreg load).
    acc = jnp.dot(w_ref[0], band_ref[:, 0:m],
                  preferred_element_type=jnp.float32)
    for dy in range(1, _KTAPS):
        acc = acc + jnp.dot(w_ref[dy],
                            band_ref[:, dy * img_w:dy * img_w + m],
                            preferred_element_type=jnp.float32)

    # Folded-BN bias + ReLU per branch (row blocks), then fuse by summation.
    z = jnp.maximum(acc + b_ref[...], 0.0)
    o_ref[...] = (z[0:cout] + z[cout:2 * cout]
                  + z[2 * cout:3 * cout]).astype(o_ref.dtype)


def _vmem_limit_bytes():
    """~3/4 of physical VMEM per core (48 MiB on v7x, 96 MiB on v5e/v6e),
    with a conservative fallback if the hardware query is unavailable."""
    cap = 64 * 1024 * 1024
    try:
        cap = int(pltpu.get_tpu_info().vmem_capacity_bytes)
    except Exception:
        pass
    return max(min(cap * 3 // 4, 100 * 1024 * 1024), 32 * 1024 * 1024)


def _pick_tile_rows(h, w, cin, cout, batch, budget_bytes):
    """Largest TH dividing H with lane-dense output blocks (TH*W % 128 == 0)
    whose per-step working set fits a VMEM budget; prefer candidates that
    keep the total grid extent >= 2 (v7x has 2 TensorCores)."""
    dxc = _round_up(_KTAPS * cin, 8)

    def step_bytes(th):
        band = dxc * (th + 4) * w * 2           # bf16 input band
        out = cout * th * w * 2                 # bf16 output tile
        acc = 3 * cout * th * w * 4             # f32 accumulator / intermediates
        wts = (_KTAPS * 3 * cout * dxc * 2) + 3 * cout * 4
        return 2 * band + 2 * out + acc + 2 * wts   # double-buffered in/out

    cands = [th for th in range(1, h + 1)
             if h % th == 0 and (th * w) % 128 == 0
             and step_bytes(th) <= budget_bytes]
    if not cands:
        return h        # fallback: one full-image tile (block == full dims)
    multi = [th for th in cands if batch * (h // th) >= 2]
    pool = multi if multi else cands
    return max(pool)


def _prepare_bands(x_nchw, th, dxc):
    """(B,Cin,H,W) -> (B, H/TH, DXC, (TH+4)*W) bf16: pad-2, 5 dx-shifted
    copies stacked into the channel dim (zero-padded to DXC = pad8(5*Cin)),
    overlapping row bands with a 4-row halo."""
    b, cin, h, w = x_nchw.shape
    nt = h // th
    xpad = jnp.pad(x_nchw.astype(jnp.bfloat16),
                   ((0, 0), (0, 0), (2, 2), (2, 2)))          # (B,Cin,H+4,W+4)
    xs = jnp.stack([xpad[:, :, :, dx:dx + w] for dx in range(_KTAPS)], axis=1)
    xs = xs.reshape(b, _KTAPS * cin, h + 4, w)                # row = dx*Cin + ci
    if dxc > _KTAPS * cin:
        xs = jnp.pad(xs, ((0, 0), (0, dxc - _KTAPS * cin), (0, 0), (0, 0)))
    bands = jnp.stack(
        [xs[:, :, t * th:t * th + th + 4, :] for t in range(nt)], axis=1)
    return bands.reshape(b, nt, dxc, (th + 4) * w)


def _prepare_weights(w1, d3, p3, d5, p5, scales, biases, dxc):
    """Stack the three branches into one (5, 3*Cout, DXC) bf16 tensor (one
    (3*Cout, DXC) block per dy shift) with BN scale folded in before the bf16
    cast, plus a (3*Cout, 1) f32 bias column.
    Depthwise ∘ pointwise == dense conv with w[dy,dx,ci,co] = d[dy,dx,ci]*p[ci,co]."""
    cin, cout = w1.shape
    w3 = d3[:, :, :, None] * p3[None, None, :, :]             # (3,3,Cin,Cout)
    w5 = d5[:, :, :, None] * p5[None, None, :, :]             # (5,5,Cin,Cout)
    wfull = jnp.zeros((_KTAPS, _KTAPS, cin, 3 * cout), jnp.float32)
    wfull = wfull.at[2, 2, :, 0:cout].set(w1)                  # 1x1 branch
    wfull = wfull.at[1:4, 1:4, :, cout:2 * cout].set(w3)       # 3x3 branch
    wfull = wfull.at[0:5, 0:5, :, 2 * cout:3 * cout].set(w5)   # 5x5 branch
    wfull = wfull * scales.reshape(3 * cout)                   # fold BN scale
    wfull = wfull.reshape(_KTAPS, _KTAPS * cin, 3 * cout)      # rows = dx*Cin+ci
    if dxc > _KTAPS * cin:
        wfull = jnp.pad(wfull, ((0, 0), (0, dxc - _KTAPS * cin), (0, 0)))
    w_stack = jnp.transpose(wfull, (0, 2, 1))                  # (5, 3*Cout, DXC)
    return (w_stack.astype(jnp.bfloat16),
            biases.reshape(3 * cout, 1).astype(jnp.float32))


@jax.jit
def affn_multi_scale_fusion(x_nchw, w1, d3, p3, d5, p5, scales, biases):
    """x1 + x2 + x3 of AFFN (ConvBNReLU 1x1 + DWSep 3x3 + DWSep 5x5), NCHW.
    Returns bf16 (the kernel is HBM-bandwidth-bound; accuracy is bounded by
    the bf16 MXU operands already)."""
    b, cin, h, w = x_nchw.shape
    cout = w1.shape[1]
    dxc = _round_up(_KTAPS * cin, 8)

    vmem_limit = _vmem_limit_bytes()
    th = _pick_tile_rows(h, w, cin, cout, b, vmem_limit // 3)
    nt = h // th
    m = th * w
    band_len = (th + 4) * w

    bands = _prepare_bands(x_nchw, th, dxc)
    w_stack, bias_col = _prepare_weights(w1, d3, p3, d5, p5, scales, biases, dxc)

    out = pl.pallas_call(
        _msf_kernel,
        out_shape=jax.ShapeDtypeStruct((b, cout, h * w), _OUT_DTYPE),
        grid_spec=pltpu.PrefetchScalarGridSpec(
            num_scalar_prefetch=0,
            grid=(b, nt),
            in_specs=[
                pl.BlockSpec((None, None, dxc, band_len),
                             lambda bi, ti: (bi, ti, 0, 0)),
                pl.BlockSpec((_KTAPS, 3 * cout, dxc), lambda bi, ti: (0, 0, 0)),
                pl.BlockSpec((3 * cout, 1), lambda bi, ti: (0, 0)),
            ],
            out_specs=pl.BlockSpec((None, cout, m), lambda bi, ti: (bi, 0, ti)),
        ),
        compiler_params=pltpu.CompilerParams(
            dimension_semantics=("parallel", "parallel"),
            vmem_limit_bytes=vmem_limit,
        ),
    )(bands, w_stack, bias_col)

    return out.reshape(b, cout, h, w)           # already channels-major (NCHW)


def _reference(x_nchw, w1, d3, p3, d5, p5, scales, biases):
    """Pure-JAX f32 reference matching the PyTorch branch structure."""
    x = x_nchw.astype(jnp.float32)
    cin, cout = w1.shape
    dn = ("NCHW", "HWIO", "NCHW")

    def conv(inp, w_hwio, pad, groups=1):
        return lax.conv_general_dilated(
            inp, w_hwio, (1, 1), [(pad, pad), (pad, pad)],
            dimension_numbers=dn, feature_group_count=groups)

    def bn_relu(y, s, bb):
        return jnp.maximum(y * s[None, :, None, None]
                           + bb[None, :, None, None], 0.0)

    # ConvBNReLU(1x1)
    y1 = bn_relu(conv(x, w1.reshape(1, 1, cin, cout), 0), scales[0], biases[0])
    # DepthwiseSeparableConv(3x3): depthwise -> pointwise -> BN -> ReLU
    z3 = conv(x, d3[:, :, None, :], 1, groups=cin)
    y2 = bn_relu(conv(z3, p3.reshape(1, 1, cin, cout), 0), scales[1], biases[1])
    # DepthwiseSeparableConv(5x5)
    z5 = conv(x, d5[:, :, None, :], 2, groups=cin)
    y3 = bn_relu(conv(z5, p5.reshape(1, 1, cin, cout), 0), scales[2], biases[2])
    return y1 + y2 + y3


if __name__ == "__main__":
    B, Cin, Cout, H, W = 2, 4, 8, 16, 16       # Cout = mid_channels
    key = jax.random.PRNGKey(0)
    ks = jax.random.split(key, 10)

    x = jax.random.normal(ks[0], (B, Cin, H, W), jnp.float32)

    # local_scale1 (1x1 conv), local_scale2/3 (depthwise + pointwise), no bias
    w1 = 0.1 * jax.random.normal(ks[1], (Cin, Cout), jnp.float32)
    d3 = 0.1 * jax.random.normal(ks[2], (3, 3, Cin), jnp.float32)
    p3 = 0.1 * jax.random.normal(ks[3], (Cin, Cout), jnp.float32)
    d5 = 0.1 * jax.random.normal(ks[4], (5, 5, Cin), jnp.float32)
    p5 = 0.1 * jax.random.normal(ks[5], (Cin, Cout), jnp.float32)

    # BatchNorm (eval mode) per branch, folded to (scale, bias)
    eps = 1e-5
    gamma = 1.0 + 0.1 * jax.random.normal(ks[6], (3, Cout), jnp.float32)
    beta = 0.1 * jax.random.normal(ks[7], (3, Cout), jnp.float32)
    mean = 0.05 * jax.random.normal(ks[8], (3, Cout), jnp.float32)
    var = jnp.abs(jax.random.normal(ks[9], (3, Cout), jnp.float32)) + 0.5
    scales = gamma / jnp.sqrt(var + eps)        # (3, Cout)
    biases = beta - mean * scales               # (3, Cout)

    out = jax.block_until_ready(
        affn_multi_scale_fusion(x, w1, d3, p3, d5, p5, scales, biases))
    ref = jax.block_until_ready(
        _reference(x, w1, d3, p3, d5, p5, scales, biases))

    # bf16 MXU operands + bf16 output (f32 accumulation) -> loose tolerance
    np.testing.assert_allclose(np.asarray(out.astype(jnp.float32)),
                               np.asarray(ref), rtol=3e-2, atol=3e-2)
    print("KERNEL_OK")
</pallas_src>

<mosaic_0001>
module attributes {stable_mosaic.version = 11 : i64} {
  func.func @_msf_kernel(%arg0: i32, %arg1: i32, %arg2: memref<1x1x24x320xbf16, #tpu.memory_space<vmem>>, %arg3: memref<5x24x24xbf16, #tpu.memory_space<vmem>>, %arg4: memref<24x1xf32, #tpu.memory_space<vmem>>, %arg5: memref<1x8x256xbf16, #tpu.memory_space<vmem>>) attributes {dimension_semantics = [#tpu.dimension_semantics<parallel>, #tpu.dimension_semantics<parallel>], iteration_bounds = array<i64: 2, 1>, scalar_prefetch = 0 : i64, scratch_operands = 0 : i64, tpu.core_type = #tpu.core_type<tc>, window_params = [{transform_indices = @transform_0, window_bounds = array<i64: 1, 1, 24, 320>}, {pipeline_mode = #tpu.pipeline_mode<synchronous>, transform_indices = @transform_1, window_bounds = array<i64: 5, 24, 24>}, {pipeline_mode = #tpu.pipeline_mode<synchronous>, transform_indices = @transform_2, window_bounds = array<i64: 24, 1>}, {transform_indices = @transform_3, window_bounds = array<i64: 1, 8, 256>}]} {
    %c0 = arith.constant 0 : index
    %c0_0 = arith.constant 0 : index
    %c0_1 = arith.constant 0 : index
    %0 = vector.load %arg3[%c0, %c0_0, %c0_1] : memref<5x24x24xbf16, #tpu.memory_space<vmem>>, vector<1x24x24xbf16>
    %1 = vector.shape_cast %0 : vector<1x24x24xbf16> to vector<24x24xbf16>
    %c0_2 = arith.constant 0 : index
    %c0_3 = arith.constant 0 : index
    %c0_4 = arith.constant 0 : index
    %c0_5 = arith.constant 0 : index
    %2 = vector.load %arg2[%c0_2, %c0_3, %c0_4, %c0_5] : memref<1x1x24x320xbf16, #tpu.memory_space<vmem>>, vector<1x1x24x256xbf16>
    %3 = vector.shape_cast %2 : vector<1x1x24x256xbf16> to vector<24x256xbf16>
    %cst = arith.constant dense<0.000000e+00> : vector<24x256xf32>
    %4 = tpu.matmul %1, %3, %cst {dimension_numbers = #tpu.dot_dimension_numbers<[1], [0], [0], [1], [0, 0, 1, 1], [], []>} : vector<24x24xbf16>, vector<24x256xbf16>, vector<24x256xf32> -> vector<24x256xf32>
    %c1 = arith.constant 1 : index
    %c0_6 = arith.constant 0 : index
    %c0_7 = arith.constant 0 : index
    %5 = vector.load %arg3[%c1, %c0_6, %c0_7] : memref<5x24x24xbf16, #tpu.memory_space<vmem>>, vector<1x24x24xbf16>
    %6 = vector.shape_cast %5 : vector<1x24x24xbf16> to vector<24x24xbf16>
    %c0_8 = arith.constant 0 : index
    %c0_9 = arith.constant 0 : index
    %c0_10 = arith.constant 0 : index
    %c16 = arith.constant 16 : index
    %7 = vector.load %arg2[%c0_8, %c0_9, %c0_10, %c16] : memref<1x1x24x320xbf16, #tpu.memory_space<vmem>>, vector<1x1x24x256xbf16>
    %8 = vector.shape_cast %7 : vector<1x1x24x256xbf16> to vector<24x256xbf16>
    %cst_11 = arith.constant dense<0.000000e+00> : vector<24x256xf32>
    %9 = tpu.matmul %6, %8, %cst_11 {dimension_numbers = #tpu.dot_dimension_numbers<[1], [0], [0], [1], [0, 0, 1, 1], [], []>} : vector<24x24xbf16>, vector<24x256xbf16>, vector<24x256xf32> -> vector<24x256xf32>
    %10 = arith.addf %4, %9 : vector<24x256xf32>
    %c2 = arith.constant 2 : index
    %c0_12 = arith.constant 0 : index
    %c0_13 = arith.constant 0 : index
    %11 = vector.load %arg3[%c2, %c0_12, %c0_13] : memref<5x24x24xbf16, #tpu.memory_space<vmem>>, vector<1x24x24xbf16>
    %12 = vector.shape_cast %11 : vector<1x24x24xbf16> to vector<24x24xbf16>
    %c0_14 = arith.constant 0 : index
    %c0_15 = arith.constant 0 : index
    %c0_16 = arith.constant 0 : index
    %c32 = arith.constant 32 : index
    %13 = vector.load %arg2[%c0_14, %c0_15, %c0_16, %c32] : memref<1x1x24x320xbf16, #tpu.memory_space<vmem>>, vector<1x1x24x256xbf16>
    %14 = vector.shape_cast %13 : vector<1x1x24x256xbf16> to vector<24x256xbf16>
    %cst_17 = arith.constant dense<0.000000e+00> : vector<24x256xf32>
    %15 = tpu.matmul %12, %14, %cst_17 {dimension_numbers = #tpu.dot_dimension_numbers<[1], [0], [0], [1], [0, 0, 1, 1], [], []>} : vector<24x24xbf16>, vector<24x256xbf16>, vector<24x256xf32> -> vector<24x256xf32>
    %16 = arith.addf %10, %15 : vector<24x256xf32>
    %c3 = arith.constant 3 : index
    %c0_18 = arith.constant 0 : index
    %c0_19 = arith.constant 0 : index
    %17 = vector.load %arg3[%c3, %c0_18, %c0_19] : memref<5x24x24xbf16, #tpu.memory_space<vmem>>, vector<1x24x24xbf16>
    %18 = vector.shape_cast %17 : vector<1x24x24xbf16> to vector<24x24xbf16>
    %c0_20 = arith.constant 0 : index
    %c0_21 = arith.constant 0 : index
    %c0_22 = arith.constant 0 : index
    %c48 = arith.constant 48 : index
    %19 = vector.load %arg2[%c0_20, %c0_21, %c0_22, %c48] : memref<1x1x24x320xbf16, #tpu.memory_space<vmem>>, vector<1x1x24x256xbf16>
    %20 = vector.shape_cast %19 : vector<1x1x24x256xbf16> to vector<24x256xbf16>
    %cst_23 = arith.constant dense<0.000000e+00> : vector<24x256xf32>
    %21 = tpu.matmul %18, %20, %cst_23 {dimension_numbers = #tpu.dot_dimension_numbers<[1], [0], [0], [1], [0, 0, 1, 1], [], []>} : vector<24x24xbf16>, vector<24x256xbf16>, vector<24x256xf32> -> vector<24x256xf32>
    %22 = arith.addf %16, %21 : vector<24x256xf32>
    %c4 = arith.constant 4 : index
    %c0_24 = arith.constant 0 : index
    %c0_25 = arith.constant 0 : index
    %23 = vector.load %arg3[%c4, %c0_24, %c0_25] : memref<5x24x24xbf16, #tpu.memory_space<vmem>>, vector<1x24x24xbf16>
    %24 = vector.shape_cast %23 : vector<1x24x24xbf16> to vector<24x24xbf16>
    %c0_26 = arith.constant 0 : index
    %c0_27 = arith.constant 0 : index
    %c0_28 = arith.constant 0 : index
    %c64 = arith.constant 64 : index
    %25 = vector.load %arg2[%c0_26, %c0_27, %c0_28, %c64] : memref<1x1x24x320xbf16, #tpu.memory_space<vmem>>, vector<1x1x24x256xbf16>
    %26 = vector.shape_cast %25 : vector<1x1x24x256xbf16> to vector<24x256xbf16>
    %cst_29 = arith.constant dense<0.000000e+00> : vector<24x256xf32>
    %27 = tpu.matmul %24, %26, %cst_29 {dimension_numbers = #tpu.dot_dimension_numbers<[1], [0], [0], [1], [0, 0, 1, 1], [], []>} : vector<24x24xbf16>, vector<24x256xbf16>, vector<24x256xf32> -> vector<24x256xf32>
    %28 = arith.addf %22, %27 : vector<24x256xf32>
    %c0_30 = arith.constant 0 : index
    %c0_31 = arith.constant 0 : index
    %29 = vector.load %arg4[%c0_30, %c0_31] : memref<24x1xf32, #tpu.memory_space<vmem>>, vector<24x1xf32>
    %30 = vector.broadcast %29 : vector<24x1xf32> to vector<24x256xf32>
    %31 = arith.addf %28, %30 : vector<24x256xf32>
    %cst_32 = arith.constant 0.000000e+00 : f32
    %32 = vector.broadcast %cst_32 : f32 to vector<24x256xf32>
    %33 = arith.maximumf %31, %32 : vector<24x256xf32>
    %34 = vector.extract_strided_slice %33 {offsets = [0, 0], sizes = [8, 256], strides = [1, 1]} : vector<24x256xf32> to vector<8x256xf32>
    %35 = vector.extract_strided_slice %33 {offsets = [8, 0], sizes = [8, 256], strides = [1, 1]} : vector<24x256xf32> to vector<8x256xf32>
    %36 = arith.addf %34, %35 : vector<8x256xf32>
    %37 = vector.extract_strided_slice %33 {offsets = [16, 0], sizes = [8, 256], strides = [1, 1]} : vector<24x256xf32> to vector<8x256xf32>
    %38 = arith.addf %36, %37 : vector<8x256xf32>
    %39 = arith.truncf %38 : vector<8x256xf32> to vector<8x256xbf16>
    %c0_33 = arith.constant 0 : index
    %c0_34 = arith.constant 0 : index
    %c0_35 = arith.constant 0 : index
    %40 = vector.load %arg5[%c0_33, %c0_34, %c0_35] : memref<1x8x256xbf16, #tpu.memory_space<vmem>>, vector<1x8x256xbf16>
    %41 = vector.shape_cast %40 : vector<1x8x256xbf16> to vector<8x256xbf16>
    %42 = vector.shape_cast %39 : vector<8x256xbf16> to vector<1x8x256xbf16>
    tpu.vector_store %arg5[%c0_33, %c0_34, %c0_35], %42 {strides = array<i32>} : memref<1x8x256xbf16, #tpu.memory_space<vmem>>, vector<1x8x256xbf16>,
    return
  }
  func.func @transform_0(%arg0: i32, %arg1: i32) -> (i32, i32, i32, i32) {
    %c0_i32 = arith.constant 0 : i32
    %c0_i32_0 = arith.constant 0 : i32
    %c0_i32_1 = arith.constant 0 : i32
    return %arg0, %arg1, %c0_i32, %c0_i32_0 : i32, i32, i32, i32
  }
  func.func @transform_1(%arg0: i32, %arg1: i32) -> (i32, i32, i32) {
    %c0_i32 = arith.constant 0 : i32
    %c0_i32_0 = arith.constant 0 : i32
    %c0_i32_1 = arith.constant 0 : i32
    %c0_i32_2 = arith.constant 0 : i32
    return %c0_i32, %c0_i32_0, %c0_i32_1 : i32, i32, i32
  }
  func.func @transform_2(%arg0: i32, %arg1: i32) -> (i32, i32) {
    %c0_i32 = arith.constant 0 : i32
    %c0_i32_0 = arith.constant 0 : i32
    %c0_i32_1 = arith.constant 0 : i32
    return %c0_i32, %c0_i32_0 : i32, i32
  }
  func.func @transform_3(%arg0: i32, %arg1: i32) -> (i32, i32, i32) {
    %c0_i32 = arith.constant 0 : i32
    %c0_i32_0 = arith.constant 0 : i32
    return %arg0, %c0_i32, %arg1 : i32, i32, i32
  }
}

</mosaic_0001>

<bundles_post_ra>
// kernel: mul.33
= control target key start
LH: loop header
LB: loop body
LE: loop exit
PB: predicated region body
PF: predicated region fallthrough
CT: control target
= control target key end

     0   :  { %s30_s8 = smov 8   ;;  %vm7_vm0 = vcmask 64512   ;;  %vm13_vm1 = vcmask 195712   ;;  %vm19_vm2 = vcmask 130112   ;;  %s47_s0 = inlined_call_operand.vmem [shape: f32[3,8], index: 0, kind: input, shape index: {}]   ;;  %s48_s1 = inlined_call_operand.vmem [shape: f32[24], index: 1, kind: output, shape index: {}]  }
   0x1   :  { %v4_v0 = vld [vmem:[%s47_s0] sm:$0xf]  ;;  %s29_s0 = smov 16  }
   0x2   :  { %5 = vst [vmem:[#allocation1] sm:$0xf] %v4_v0 }
   0x9   :  { %v10_v1 = vld [vmem:[#allocation1 + $0x2] sm:$0x1]   ;;  %v16_v2 = vld [vmem:[#allocation1 + $0x1] sm:$0x1]   ;;  %v6_v3 = vld [vmem:[#allocation1] sm:$0x1]  }
   0xa   :  { %11 = vrot.lane.b32.xlu0 %v10_v1, %s29_s0  ;;  %8 = vst.msk [vmem:[#allocation0] sm:$0x1] %vm7_vm0, %v6_v3  }
  0x12   :  { %17 = vrot.lane.b32.xlu0 %v16_v2, %s30_s8 }
  0x7c   :  { %v12_v4 = vpop.permute.xlu0 %11  }
  0x7d   :  { %14 = vst.msk [vmem:[#allocation0] sm:$0x1] %vm13_vm1, %v12_v4  }
  0x84   :  { %v18_v5 = vpop.permute.xlu0 %17  }
  0x85   :  { %20 = vst.msk [vmem:[#allocation0] sm:$0x1] %vm19_vm2, %v18_v5  }
  0x8c   :  { %v23_v6 = vld [vmem:[#allocation0] sm:$0x1] }
  0x8d   :  { %26 = vst [vmem:[%s48_s1] sm:$0x1] %v23_v6 }

</bundles_post_ra>
